<compile_context>
chip_gen: v7x
topology: tpu7x:2x2x1
jax: 0.10.0
libtpu: 0.0.40
codegen_flags: <defaults>
</compile_context>

<pallas_src>
import jax
import jax.numpy as jnp
from jax.experimental import pallas as pl
from jax.experimental.pallas import tpu as pltpu

_EPS = 1e-5
_LANE = 128


# ----------------------------- helpers ---------------------------------------

def _ceil_to(x, m):
    return ((x + m - 1) // m) * m


def _pad_last(x, n):
    pad = n - x.shape[-1]
    if pad == 0:
        return x
    return jnp.pad(x, [(0, 0)] * (x.ndim - 1) + [(0, pad)])


def _pad2(x, rows, cols):
    return jnp.pad(x, [(0, rows - x.shape[0]), (0, cols - x.shape[1])])


def _bn_sigmoid(h, gamma, beta):
    """Training-mode BatchNorm1d (biased batch stats) + sigmoid, f32 math."""
    inv_n = 1.0 / h.shape[0]
    mean = jnp.sum(h, axis=0, keepdims=True) * inv_n
    d = h - mean
    var = jnp.sum(d * d, axis=0, keepdims=True) * inv_n     # two-pass variance
    hn = d * jax.lax.rsqrt(var + _EPS) * gamma + beta
    # sigmoid via exp + approximate reciprocal: both land on the EUP slot.
    return pl.reciprocal(1.0 + jnp.exp(-hn), approx=True)


# ----------------------------- kernels ---------------------------------------

def _mem2nn_step_kernel(xam_ref, w12_ref, w2h_ref, p_ref, o_ref):
    """One Memory2NN forward step.  xam = cat(x, a, m), bf16, lane-padded."""
    npad = w2h_ref.shape[0]
    p = p_ref[...]                                           # [8, Npad] f32
    g1, be1, g2, be2 = p[0:1, :], p[1:2, :], p[2:3, :], p[3:4, :]

    # One merged dot: cols [0,Npad) -> layer-1 pre-act, cols [Npad,2Npad) ->
    # layer-2 contribution of the (input, action) segment (memory rows zeroed).
    y = jnp.dot(xam_ref[...], w12_ref[...], preferred_element_type=jnp.float32)

    h1 = _bn_sigmoid(y[:, :npad], g1, be1)
    h2 = _bn_sigmoid(
        y[:, npad:]
        + jnp.dot(h1.astype(jnp.bfloat16), w2h_ref[...],
                  preferred_element_type=jnp.float32),
        g2, be2)
    o_ref[...] = h2.astype(o_ref.dtype)


def _mem2nn_seq_kernel(xa_ref, m0_ref, wxa12_ref, w1m_ref, w2h_ref, p_ref,
                       o_ref, mem_ref):
    """Recurrent Memory2NN: grid over T, weights resident, state in scratch."""
    npad = w2h_ref.shape[0]
    t = pl.program_id(0)

    @pl.when(t == 0)
    def _():
        mem_ref[...] = m0_ref[...]

    p = p_ref[...]
    g1, be1, g2, be2 = p[0:1, :], p[1:2, :], p[2:3, :], p[3:4, :]

    xa = xa_ref[0]                                           # [B, ITpad] bf16
    # Merged (input, action) contribution for both layers: one dot.
    y = jnp.dot(xa, wxa12_ref[...], preferred_element_type=jnp.float32)

    h1 = _bn_sigmoid(
        y[:, :npad]
        + jnp.dot(mem_ref[...].astype(jnp.bfloat16), w1m_ref[...],
                  preferred_element_type=jnp.float32),
        g1, be1)
    h2 = _bn_sigmoid(
        y[:, npad:]
        + jnp.dot(h1.astype(jnp.bfloat16), w2h_ref[...],
                  preferred_element_type=jnp.float32),
        g2, be2)

    mem_ref[...] = h2                                        # f32 carried state
    o_ref[0] = h2.astype(o_ref.dtype)


# ----------------------------- packing ---------------------------------------

def pack_params(params, input_dim, target_dim, memory_dim):
    """Pack PyTorch-layout params into lane-dense bf16/f32 slabs."""
    it = input_dim + target_dim
    flat = it + memory_dim
    npad = _ceil_to(max(memory_dim, _LANE), _LANE)
    fpad = _ceil_to(max(flat, _LANE), _LANE)
    itpad = _ceil_to(max(it, _LANE), _LANE)

    w1t = params["w1"].T.astype(jnp.float32)                 # [flat, M]
    w2t = params["w2"].T.astype(jnp.float32)                 # [flat, M]

    # --- single-step slabs ---------------------------------------------------
    w1_pad = _pad2(w1t, fpad, npad)
    w2xa_pad = _pad2(w2t.at[it:].set(0.0), fpad, npad)       # memory rows -> 0
    w12 = jnp.concatenate([w1_pad, w2xa_pad], axis=1).astype(jnp.bfloat16)

    w2h = _pad2(w2t[it:], npad, npad).astype(jnp.bfloat16)   # hidden-segment rows

    def row(v):
        return _pad_last(v.reshape(1, -1).astype(jnp.float32), npad)

    pslab = jnp.concatenate(
        [row(params["g1"]), row(params["be1"]),
         row(params["g2"]), row(params["be2"]),
         jnp.zeros((4, npad), jnp.float32)],
        axis=0)                                              # [8, Npad]

    # --- recurrent (seq) slabs ------------------------------------------------
    wxa12 = jnp.concatenate(
        [_pad2(w1t[:it], itpad, npad), _pad2(w2t[:it], itpad, npad)],
        axis=1).astype(jnp.bfloat16)                         # [ITpad, 2*Npad]
    w1m = _pad2(w1t[it:], npad, npad).astype(jnp.bfloat16)   # [Npad, Npad]

    return {"w12": w12, "w2h": w2h, "pslab": pslab, "wxa12": wxa12, "w1m": w1m}


# ----------------------------- wrappers ---------------------------------------

@jax.jit
def memory2nn_forward(input_symbol, action, memory, packed):
    """Single Memory2NN.forward step (training-mode BatchNorm)."""
    B = input_symbol.shape[0]
    memory_dim = memory.shape[1]
    npad = packed["w2h"].shape[0]
    fpad = packed["w12"].shape[0]

    xam = jnp.concatenate([input_symbol, action, memory], axis=1)
    xam = _pad_last(xam.astype(jnp.float32), fpad).astype(jnp.bfloat16)

    vmem = pl.BlockSpec(memory_space=pltpu.MemorySpace.VMEM)
    out = pl.pallas_call(
        _mem2nn_step_kernel,
        out_shape=jax.ShapeDtypeStruct((B, npad), jnp.float32),
        in_specs=[vmem, vmem, vmem, vmem],
        out_specs=vmem,
    )(xam, packed["w12"], packed["w2h"], packed["pslab"])
    return out[:, :memory_dim]


@jax.jit
def memory2nn_forward_seq(input_seq, action_seq, memory0, packed):
    """Apply Memory2NN recurrently over T steps inside one kernel.

    Returns all memory states m_1 .. m_T, shape [T, B, memory_dim].
    """
    T, B = input_seq.shape[0], input_seq.shape[1]
    memory_dim = memory0.shape[1]
    npad = packed["w2h"].shape[0]
    itpad = packed["wxa12"].shape[0]

    xa = jnp.concatenate([input_seq, action_seq], axis=-1).astype(jnp.float32)
    xa = _pad_last(xa, itpad).astype(jnp.bfloat16)           # [T, B, ITpad]
    m0 = _pad_last(memory0.astype(jnp.float32), npad)        # [B, Npad]

    def whole(*shape):
        return pl.BlockSpec(shape, lambda t, _s=shape: (0,) * len(_s))

    out = pl.pallas_call(
        _mem2nn_seq_kernel,
        out_shape=jax.ShapeDtypeStruct((T, B, npad), jnp.float32),
        grid=(T,),
        in_specs=[
            pl.BlockSpec((1, B, itpad), lambda t: (t, 0, 0)),  # xa per step
            whole(B, npad),                                    # initial memory
            whole(itpad, 2 * npad),                            # wxa12 (resident)
            whole(npad, npad),                                 # w1m   (resident)
            whole(npad, npad),                                 # w2h   (resident)
            whole(8, npad),                                    # gamma/beta slab
        ],
        out_specs=pl.BlockSpec((1, B, npad), lambda t: (t, 0, 0)),
        scratch_shapes=[pltpu.VMEM((B, npad), jnp.float32)],   # carried memory
        compiler_params=pltpu.CompilerParams(
            dimension_semantics=("arbitrary",)),               # true recurrence
    )(xa, m0, packed["wxa12"], packed["w1m"], packed["w2h"], packed["pslab"])
    return out[:, :, :memory_dim]


# ----------------------------- init & references ------------------------------

def init_params(key, input_dim, target_dim, memory_dim):
    """Deterministic params in PyTorch layout (Linear: W [out, in], b [out])."""
    flat = input_dim + target_dim + memory_dim
    k1, k2, k3, k4 = jax.random.split(key, 4)
    bound = 1.0 / jnp.sqrt(jnp.float32(flat))
    return {
        "w1": jax.random.uniform(k1, (memory_dim, flat), jnp.float32, -bound, bound),
        "b1": jax.random.uniform(k2, (memory_dim,), jnp.float32, -bound, bound),
        "g1": jnp.ones((memory_dim,), jnp.float32),
        "be1": jnp.zeros((memory_dim,), jnp.float32),
        "w2": jax.random.uniform(k3, (memory_dim, flat), jnp.float32, -bound, bound),
        "b2": jax.random.uniform(k4, (memory_dim,), jnp.float32, -bound, bound),
        "g2": jnp.ones((memory_dim,), jnp.float32),
        "be2": jnp.zeros((memory_dim,), jnp.float32),
    }


def _bn_sig_ref(h, g, be):
    mu = jnp.mean(h, axis=0, keepdims=True)
    var = jnp.mean((h - mu) ** 2, axis=0, keepdims=True)
    return jax.nn.sigmoid((h - mu) / jnp.sqrt(var + _EPS) * g + be)


def _reference_forward(x, a, m, p):
    """Plain-JAX f32 reference with PyTorch Memory2NN semantics (training BN)."""
    flat = jnp.concatenate([x, a, m], axis=1)
    h = _bn_sig_ref(flat @ p["w1"].T + p["b1"], p["g1"], p["be1"])
    flat2 = jnp.concatenate([x, a, h], axis=1)
    return _bn_sig_ref(flat2 @ p["w2"].T + p["b2"], p["g2"], p["be2"])


def _reference_forward_bf16(x, a, m, p):
    """Reference mimicking the kernel's precision: bf16 matmul operands,
    f32 accumulation, f32 BN/sigmoid."""
    bf = lambda v: v.astype(jnp.bfloat16)
    flat = jnp.concatenate([x, a, m], axis=1)
    h = jnp.dot(bf(flat), bf(p["w1"].T), preferred_element_type=jnp.float32) + p["b1"]
    h = _bn_sig_ref(h, p["g1"], p["be1"])
    flat2 = jnp.concatenate([x, a, h], axis=1)
    h2 = jnp.dot(bf(flat2), bf(p["w2"].T), preferred_element_type=jnp.float32) + p["b2"]
    return _bn_sig_ref(h2, p["g2"], p["be2"])


def _reference_seq(step_fn, x_seq, a_seq, m0, p):
    def body(m, xa):
        m_next = step_fn(xa[0], xa[1], m, p)
        return m_next, m_next
    _, ms = jax.lax.scan(body, m0, (x_seq, a_seq))
    return ms


# ----------------------------- main -------------------------------------------

if __name__ == "__main__":
    input_dim, target_dim, memory_dim = 8, 8, 32
    B, T = 8, 8

    key = jax.random.PRNGKey(0)
    kx, ka, km, kp, kxs, kas = jax.random.split(key, 6)
    input_symbol = jax.random.normal(kx, (B, input_dim), jnp.float32)
    action = jax.random.normal(ka, (B, target_dim), jnp.float32)
    memory = jax.random.normal(km, (B, memory_dim), jnp.float32)

    params = init_params(kp, input_dim, target_dim, memory_dim)
    packed = pack_params(params, input_dim, target_dim, memory_dim)

    # ---- single-step forward (matches Memory2NN.forward) ----
    out = jax.block_until_ready(memory2nn_forward(input_symbol, action, memory, packed))
    assert out.shape == (B, memory_dim)
    ref_bf = _reference_forward_bf16(input_symbol, action, memory, params)
    ref_f32 = _reference_forward(input_symbol, action, memory, params)
    assert jnp.allclose(out, ref_bf, atol=2e-3, rtol=2e-3), "step mismatch vs bf16 ref"
    assert jnp.allclose(out, ref_f32, atol=2e-2, rtol=2e-2), "step mismatch vs f32 ref"

    # ---- recurrent forward: time loop inside the kernel, weights resident ----
    input_seq = jax.random.normal(kxs, (T, B, input_dim), jnp.float32)
    action_seq = jax.random.normal(kas, (T, B, target_dim), jnp.float32)
    out_seq = jax.block_until_ready(
        memory2nn_forward_seq(input_seq, action_seq, memory, packed))
    assert out_seq.shape == (T, B, memory_dim)
    ref_seq_bf = _reference_seq(_reference_forward_bf16, input_seq, action_seq,
                                memory, params)
    ref_seq_f32 = _reference_seq(_reference_forward, input_seq, action_seq,
                                 memory, params)
    assert jnp.allclose(out_seq, ref_seq_bf, atol=4e-3, rtol=4e-3), \
        "seq mismatch vs bf16 ref"
    assert jnp.allclose(out_seq, ref_seq_f32, atol=5e-2, rtol=5e-2), \
        "seq mismatch vs f32 ref"

    print("KERNEL_OK")
</pallas_src>

<mosaic_0001>
module attributes {stable_mosaic.version = 11 : i64} {
  func.func @_mem2nn_step_kernel(%arg0: memref<8x128xbf16, #tpu.memory_space<vmem>>, %arg1: memref<128x256xbf16, #tpu.memory_space<vmem>>, %arg2: memref<128x128xbf16, #tpu.memory_space<vmem>>, %arg3: memref<8x128xf32, #tpu.memory_space<vmem>>, %arg4: memref<8x128xf32, #tpu.memory_space<vmem>>) attributes {dimension_semantics = [], scalar_prefetch = 0 : i64, scratch_operands = 0 : i64, tpu.core_type = #tpu.core_type<tc>} {
    %c0 = arith.constant 0 : index
    %c0_0 = arith.constant 0 : index
    %0 = vector.load %arg3[%c0, %c0_0] : memref<8x128xf32, #tpu.memory_space<vmem>>, vector<8x128xf32>
    %1 = vector.extract_strided_slice %0 {offsets = [0, 0], sizes = [1, 128], strides = [1, 1]} : vector<8x128xf32> to vector<1x128xf32>
    %2 = vector.extract_strided_slice %0 {offsets = [1, 0], sizes = [1, 128], strides = [1, 1]} : vector<8x128xf32> to vector<1x128xf32>
    %3 = vector.extract_strided_slice %0 {offsets = [2, 0], sizes = [1, 128], strides = [1, 1]} : vector<8x128xf32> to vector<1x128xf32>
    %4 = vector.extract_strided_slice %0 {offsets = [3, 0], sizes = [1, 128], strides = [1, 1]} : vector<8x128xf32> to vector<1x128xf32>
    %c0_1 = arith.constant 0 : index
    %c0_2 = arith.constant 0 : index
    %5 = vector.load %arg0[%c0_1, %c0_2] : memref<8x128xbf16, #tpu.memory_space<vmem>>, vector<8x128xbf16>
    %c0_3 = arith.constant 0 : index
    %c0_4 = arith.constant 0 : index
    %6 = vector.load %arg1[%c0_3, %c0_4] : memref<128x256xbf16, #tpu.memory_space<vmem>>, vector<128x256xbf16>
    %cst = arith.constant dense<0.000000e+00> : vector<8x256xf32>
    %7 = tpu.matmul %5, %6, %cst {dimension_numbers = #tpu.dot_dimension_numbers<[1], [0], [0], [1], [0, 0, 1, 1], [], []>} : vector<8x128xbf16>, vector<128x256xbf16>, vector<8x256xf32> -> vector<8x256xf32>
    %8 = vector.extract_strided_slice %7 {offsets = [0, 0], sizes = [8, 128], strides = [1, 1]} : vector<8x256xf32> to vector<8x128xf32>
    %cst_5 = arith.constant dense<0.000000e+00> : vector<128xf32>
    %9 = vector.multi_reduction <add>, %8, %cst_5 [0] : vector<8x128xf32> to vector<128xf32>
    %10 = vector.shape_cast %9 : vector<128xf32> to vector<1x128xf32>
    %cst_6 = arith.constant 1.250000e-01 : f32
    %11 = vector.broadcast %cst_6 : f32 to vector<1x128xf32>
    %12 = arith.mulf %10, %11 : vector<1x128xf32>
    %13 = vector.broadcast %12 : vector<1x128xf32> to vector<8x128xf32>
    %14 = arith.subf %8, %13 : vector<8x128xf32>
    %15 = arith.mulf %14, %14 : vector<8x128xf32>
    %cst_7 = arith.constant dense<0.000000e+00> : vector<128xf32>
    %16 = vector.multi_reduction <add>, %15, %cst_7 [0] : vector<8x128xf32> to vector<128xf32>
    %17 = vector.shape_cast %16 : vector<128xf32> to vector<1x128xf32>
    %cst_8 = arith.constant 1.250000e-01 : f32
    %18 = vector.broadcast %cst_8 : f32 to vector<1x128xf32>
    %19 = arith.mulf %17, %18 : vector<1x128xf32>
    %cst_9 = arith.constant 9.99999974E-6 : f32
    %20 = vector.broadcast %cst_9 : f32 to vector<1x128xf32>
    %21 = arith.addf %19, %20 : vector<1x128xf32>
    %22 = math.rsqrt %21 : vector<1x128xf32>
    %23 = vector.broadcast %22 : vector<1x128xf32> to vector<8x128xf32>
    %24 = arith.mulf %14, %23 : vector<8x128xf32>
    %25 = vector.broadcast %1 : vector<1x128xf32> to vector<8x128xf32>
    %26 = arith.mulf %24, %25 : vector<8x128xf32>
    %27 = vector.broadcast %2 : vector<1x128xf32> to vector<8x128xf32>
    %28 = arith.addf %26, %27 : vector<8x128xf32>
    %cst_10 = arith.constant 0.000000e+00 : f32
    %29 = vector.broadcast %cst_10 : f32 to vector<8x128xf32>
    %30 = arith.subf %29, %28 : vector<8x128xf32>
    %31 = math.exp %30 : vector<8x128xf32>
    %cst_11 = arith.constant 1.000000e+00 : f32
    %32 = vector.broadcast %cst_11 : f32 to vector<8x128xf32>
    %33 = arith.addf %32, %31 : vector<8x128xf32>
    %34 = tpu.reciprocal %33 {approx = true} : vector<8x128xf32> -> vector<8x128xf32>
    %35 = vector.extract_strided_slice %7 {offsets = [0, 128], sizes = [8, 128], strides = [1, 1]} : vector<8x256xf32> to vector<8x128xf32>
    %36 = arith.truncf %34 : vector<8x128xf32> to vector<8x128xbf16>
    %c0_12 = arith.constant 0 : index
    %c0_13 = arith.constant 0 : index
    %37 = vector.load %arg2[%c0_12, %c0_13] : memref<128x128xbf16, #tpu.memory_space<vmem>>, vector<128x128xbf16>
    %cst_14 = arith.constant dense<0.000000e+00> : vector<8x128xf32>
    %38 = tpu.matmul %36, %37, %cst_14 {dimension_numbers = #tpu.dot_dimension_numbers<[1], [0], [0], [1], [0, 0, 1, 1], [], []>} : vector<8x128xbf16>, vector<128x128xbf16>, vector<8x128xf32> -> vector<8x128xf32>
    %39 = arith.addf %35, %38 : vector<8x128xf32>
    %cst_15 = arith.constant dense<0.000000e+00> : vector<128xf32>
    %40 = vector.multi_reduction <add>, %39, %cst_15 [0] : vector<8x128xf32> to vector<128xf32>
    %41 = vector.shape_cast %40 : vector<128xf32> to vector<1x128xf32>
    %cst_16 = arith.constant 1.250000e-01 : f32
    %42 = vector.broadcast %cst_16 : f32 to vector<1x128xf32>
    %43 = arith.mulf %41, %42 : vector<1x128xf32>
    %44 = vector.broadcast %43 : vector<1x128xf32> to vector<8x128xf32>
    %45 = arith.subf %39, %44 : vector<8x128xf32>
    %46 = arith.mulf %45, %45 : vector<8x128xf32>
    %cst_17 = arith.constant dense<0.000000e+00> : vector<128xf32>
    %47 = vector.multi_reduction <add>, %46, %cst_17 [0] : vector<8x128xf32> to vector<128xf32>
    %48 = vector.shape_cast %47 : vector<128xf32> to vector<1x128xf32>
    %cst_18 = arith.constant 1.250000e-01 : f32
    %49 = vector.broadcast %cst_18 : f32 to vector<1x128xf32>
    %50 = arith.mulf %48, %49 : vector<1x128xf32>
    %cst_19 = arith.constant 9.99999974E-6 : f32
    %51 = vector.broadcast %cst_19 : f32 to vector<1x128xf32>
    %52 = arith.addf %50, %51 : vector<1x128xf32>
    %53 = math.rsqrt %52 : vector<1x128xf32>
    %54 = vector.broadcast %53 : vector<1x128xf32> to vector<8x128xf32>
    %55 = arith.mulf %45, %54 : vector<8x128xf32>
    %56 = vector.broadcast %3 : vector<1x128xf32> to vector<8x128xf32>
    %57 = arith.mulf %55, %56 : vector<8x128xf32>
    %58 = vector.broadcast %4 : vector<1x128xf32> to vector<8x128xf32>
    %59 = arith.addf %57, %58 : vector<8x128xf32>
    %cst_20 = arith.constant 0.000000e+00 : f32
    %60 = vector.broadcast %cst_20 : f32 to vector<8x128xf32>
    %61 = arith.subf %60, %59 : vector<8x128xf32>
    %62 = math.exp %61 : vector<8x128xf32>
    %cst_21 = arith.constant 1.000000e+00 : f32
    %63 = vector.broadcast %cst_21 : f32 to vector<8x128xf32>
    %64 = arith.addf %63, %62 : vector<8x128xf32>
    %65 = tpu.reciprocal %64 {approx = true} : vector<8x128xf32> -> vector<8x128xf32>
    %c0_22 = arith.constant 0 : index
    %c0_23 = arith.constant 0 : index
    %66 = vector.load %arg4[%c0_22, %c0_23] : memref<8x128xf32, #tpu.memory_space<vmem>>, vector<8x128xf32>
    tpu.vector_store %arg4[%c0_22, %c0_23], %65 {strides = array<i32>} : memref<8x128xf32, #tpu.memory_space<vmem>>, vector<8x128xf32>,
    return
  }
}

</mosaic_0001>

<bundles_post_ra>
// kernel: memory2nn_forward.1
= control target key start
LH: loop header
LB: loop body
LE: loop exit
PB: predicated region body
PF: predicated region fallthrough
CT: control target
= control target key end

     0   :  { %9 = vsyncpa [#allocation3], 0  ;;  %s648_s0 = inlined_call_operand.vmem [shape: bf16[8,128], index: 0, kind: input, shape index: {}]   ;;  %s649_s1 = inlined_call_operand.hbm [shape: bf16[128,256], index: 1, kind: input, shape index: {}]   ;;  %s650_s2 = inlined_call_operand.vmem [shape: bf16[128,128], index: 2, kind: input, shape index: {}]   ;;  %s651_s3 = inlined_call_operand.hbm [shape: f32[8,128], index: 3, kind: input, shape index: {}]   ;;  %s652_s4 = inlined_call_operand.hbm [shape: f32[8,128], index: 4, kind: output, shape index: {}]  }
   0x1   :  { %10 = vsyncpa [#allocation6], 0 }
   0x2   :  { %11 = vsyncpa [#allocation4], 0  ;;  %s552_s15 = smov [#allocation2]   ;;  %s480_s19 = scalar_lea.hbm %s649_s1, 2048 }
   0x3   :  { %s19_s16 = sshll.u32 %s552_s15, 4  ;;  %p481_p0 = scmp.ne.s32.totalorder %s649_s1, %s480_s19  ;;  %s20_s16 = int_to_ptr.vmem [resolvable:$true] %s19_s16 }
   0x4   :  { %p484_p1 = scmp.lt.u32.totalorder %s480_s19, %s649_s1 }
   0x6   :  { %p486_p2 = pnand %p484_p1, %p481_p0 }
   0x8   :  { %489 = shalt.err (!%p486_p2)
}
   0x9   :  { %s490_s24 = scalar_lea.vmem %s20_s16, 2048  ;;  %p495_p4 = scmp.lt.s32.totalorder %s20_s16, %s20_s16 }
   0xa   :  { %p491_p3 = scmp.ne.s32.totalorder %s20_s16, %s490_s24  ;;  %p496_p5 = scmp.lt.s32.totalorder %s490_s24, %s490_s24 }
   0xc   :  { %p497_p6 = por %p496_p5, %p495_p4 }
   0xe   :  { %p498_p7 = pnand %p497_p6, %p491_p3 }
  0x10   :  { %501 = shalt.err (!%p498_p7)
}
  0x11   :  { %s553_s25 = smov 128   ;;  %s554_s26 = smov 8  }
  0x12   :  { %25 = dma.hbm_to_vmem [thread:$0]  %s649_s1, 2048, %s20_s16, [#allocation3], %s553_s25, %s553_s25, %s554_s26  }
  0x13   :  { %s555_s29 = smov [#allocation5]   ;;  %s502_s7 = scalar_lea.hbm %s651_s3, 128 }
  0x14   :  { %s34_s30 = sshll.u32 %s555_s29, 4  ;;  %p503_p8 = scmp.ne.s32.totalorder %s651_s3, %s502_s7  ;;  %s35_s30 = int_to_ptr.vmem [resolvable:$true] %s34_s30 }
  0x15   :  { %p506_p9 = scmp.lt.u32.totalorder %s502_s7, %s651_s3 }
  0x17   :  { %p508_p10 = pnand %p506_p9, %p503_p8 }
  0x19   :  { %511 = shalt.err (!%p508_p10)
}
  0x1a   :  { %s512_s12 = scalar_lea.vmem %s35_s30, 128  ;;  %p517_p12 = scmp.lt.s32.totalorder %s35_s30, %s35_s30 }
  0x1b   :  { %p513_p11 = scmp.ne.s32.totalorder %s35_s30, %s512_s12  ;;  %p518_p13 = scmp.lt.s32.totalorder %s512_s12, %s512_s12 }
  0x1d   :  { %p519_p0 = por %p518_p13, %p517_p12 }
  0x1f   :  { %p520_p1 = pnand %p519_p0, %p513_p11 }
  0x21   :  { %523 = shalt.err (!%p520_p1)
}
  0x22   :  { %37 = dma.hbm_to_vmem [thread:$0]  %s651_s3, 128, %s35_s30, [#allocation6]  }
  0x23   :  { %546 = dma.done.wait [#allocation3], 2048  }
  0x24   :  { %547 = vsyncadd [#allocation3], 4294965248 }
  0x25   :  { %548 = dma.done.wait [#allocation6], 128  }
  0x26   :  { %549 = vsyncadd [#allocation6], 4294967168  ;;  %v556_v0 = vmov 0   ;;  %v436_v1 = vld [vmem:[#allocation2 + $0x4] ss:$8 sps:$4 sm:$0xff]   ;;  %v557_v19 = vmov 0.0   ;;  %v203_v47 = vlaneseq }
  0x27   :  { %175 = vmatprep.mubr.bf16.mxu0 %v556_v0  ;;  %v438_v2 = vld [vmem:[#allocation2] ss:$8 sps:$4 sm:$0xff]   ;;  %143 = vmatprep.subr.bf16.mxu0 %v436_v1  ;;  %v439_v3 = vld [vmem:[#allocation2 + $0x14] ss:$8 sps:$4 sm:$0xff]   ;;  %v441_v4 = vld [vmem:[#allocation2 + $0x10] ss:$8 sps:$4 sm:$0xff]  }
  0x28   :  { %144 = vmatpush1.bf16.msra.mxu0 %v438_v2  ;;  %v442_v5 = vld [vmem:[#allocation2 + $0x24] ss:$8 sps:$4 sm:$0xff]   ;;  %v444_v6 = vld [vmem:[#allocation2 + $0x20] ss:$8 sps:$4 sm:$0xff]   ;;  %v445_v7 = vld [vmem:[#allocation2 + $0x34] ss:$8 sps:$4 sm:$0xff]   ;;  %408 = vmatprep.subr.bf16.mxu1 %v557_v19 }
  0x29   :  { %145 = vmatprep.subr.bf16.mxu0 %v439_v3  ;;  %v447_v8 = vld [vmem:[#allocation2 + $0x30] ss:$8 sps:$4 sm:$0xff]   ;;  %v448_v9 = vld [vmem:[#allocation2 + $0x44] ss:$8 sps:$4 sm:$0xff]   ;;  %v450_v10 = vld [vmem:[#allocation2 + $0x40] ss:$8 sps:$4 sm:$0xff]  }
  0x2a   :  { %v451_v11 = vld [vmem:[#allocation2 + $0x54] ss:$8 sps:$4 sm:$0xff]   ;;  %v453_v12 = vld [vmem:[#allocation2 + $0x50] ss:$8 sps:$4 sm:$0xff]   ;;  %v454_v13 = vld [vmem:[#allocation2 + $0x64] ss:$8 sps:$4 sm:$0xff]  }
  0x2b   :  { %v456_v14 = vld [vmem:[#allocation2 + $0x60] ss:$8 sps:$4 sm:$0xff]   ;;  %v457_v15 = vld [vmem:[#allocation2 + $0x74] ss:$8 sps:$4 sm:$0xff]   ;;  %v459_v16 = vld [vmem:[#allocation2 + $0x70] ss:$8 sps:$4 sm:$0xff]  }
  0x2c   :  { %146 = vmatpush1.bf16.msra.mxu0 %v441_v4  ;;  %v46_v17 = vld [vmem:[%s648_s0] sm:$0xf]  ;;  %v461_v20 = vld [vmem:[%s650_s2 + $0x8] sm:$0xff]   ;;  %vm558_vm0 = vmmov 0   ;;  %v462_v21 = vld [vmem:[%s650_s2 + $0x10] sm:$0xff]   ;;  %v204_v49 = vshrl.u32 %v203_v47, 7 }
  0x2d   :  { %147 = vmatprep.subr.bf16.mxu0 %v442_v5  ;;  %v460_v18 = vld [vmem:[%s650_s2] sm:$0xff]   ;;  %424 = vmatprep.mubr.msk.bf16.mxu1 %vm558_vm0, %v557_v19  ;;  %v463_v22 = vld [vmem:[%s650_s2 + $0x18] sm:$0xff]   ;;  %v465_v24 = vld [vmem:[%s650_s2 + $0x28] sm:$0xff]  }
  0x2e   :  { %409 = vmatpush3.bf16.msra.mxu1 %v460_v18  ;;  %v464_v23 = vld [vmem:[%s650_s2 + $0x20] sm:$0xff]   ;;  %v466_v25 = vld [vmem:[%s650_s2 + $0x30] sm:$0xff]   ;;  %v467_v26 = vld [vmem:[%s650_s2 + $0x38] sm:$0xff]   ;;  %v205_v50 = vsub.s32 0, %v204_v49  ;;  %v210_v52 = vsub.s32 1, %v204_v49  ;;  %s559_s2 = smov [#allocation7]  }
  0x2f   :  { %410 = vmatprep.subr.bf16.mxu1 %v557_v19  ;;  %v45_v51 = vld [vmem:[#allocation5] sm:$0xff]  ;;  %s365_s30 = sshll.u32 %s559_s2, 4  ;;  %s366_s30 = int_to_ptr.vmem [resolvable:$true] %s365_s30 }
  0x30   :  { %148 = vmatpush1.bf16.msra.mxu0 %v444_v6  ;;  %v206_v53 = vrot.slane %v45_v51, %v205_v50  ;;  %v211_v56 = vrot.slane %v45_v51, %v210_v52  ;;  %s524_s5 = scalar_lea.vmem %s366_s30, 128  ;;  %p529_p3 = scmp.lt.s32.totalorder %s366_s30, %s366_s30 }
  0x31   :  { %149 = vmatprep.subr.bf16.mxu0 %v445_v7  ;;  %p525_p2 = scmp.ne.s32.totalorder %s366_s30, %s524_s5  ;;  %p530_p4 = scmp.lt.s32.totalorder %s524_s5, %s524_s5 }
  0x32   :  { %411 = vmatpush3.bf16.msra.mxu1 %v461_v20 }
  0x33   :  { %412 = vmatprep.subr.bf16.mxu1 %v557_v19  ;;  %p531_p5 = por %p530_p4, %p529_p3 }
  0x34   :  { %150 = vmatpush1.bf16.msra.mxu0 %v447_v8 }
  0x35   :  { %151 = vmatprep.subr.bf16.mxu0 %v448_v9  ;;  %p532_p6 = pnand %p531_p5, %p525_p2 }
  0x36   :  { %413 = vmatpush3.bf16.msra.mxu1 %v462_v21 }
  0x37   :  { %414 = vmatprep.subr.bf16.mxu1 %v557_v19 }
  0x38   :  { %152 = vmatpush1.bf16.msra.mxu0 %v450_v10 }
  0x39   :  { %153 = vmatprep.subr.bf16.mxu0 %v451_v11 }
  0x3a   :  { %415 = vmatpush3.bf16.msra.mxu1 %v463_v22 }
  0x3b   :  { %416 = vmatprep.subr.bf16.mxu1 %v557_v19 }
  0x3c   :  { %154 = vmatpush1.bf16.msra.mxu0 %v453_v12 }
  0x3d   :  { %155 = vmatprep.subr.bf16.mxu0 %v454_v13 }
  0x3e   :  { %417 = vmatpush3.bf16.msra.mxu1 %v464_v23  ;;  %v345_v23 = vsub.s32 2, %v204_v49 }
  0x3f   :  { %418 = vmatprep.subr.bf16.mxu1 %v557_v19 }
  0x40   :  { %156 = vmatpush1.bf16.msra.mxu0 %v456_v14 }
  0x41   :  { %157 = vmatprep.subr.bf16.mxu0 %v457_v15 }
  0x42   :  { %419 = vmatpush3.bf16.msra.mxu1 %v465_v24  ;;  %v350_v24 = vsub.s32 3, %v204_v49 }
  0x43   :  { %420 = vmatprep.subr.bf16.mxu1 %v557_v19 }
  0x44   :  { %158 = vmatpush1.bf16.msra.mxu0 %v459_v16 }
  0x46   :  { %421 = vmatpush3.bf16.msra.mxu1 %v466_v25  ;;  %v346_v25 = vrot.slane %v45_v51, %v345_v23 }
  0x47   :  { %176 = vmatmul.mubr.bf16.vlgmr.msra.gmra.mrb[0].mxu0 %v46_v17  ;;  %422 = vmatprep.subr.bf16.mxu1 %v557_v19 }
  0x4a   :  { %423 = vmatpush3.bf16.msra.mxu1 %v467_v26 }
 0x11a   :  { %v177_v27 = vpop.f32.mrb[0].mxu0 }
 0x11b   :  { %v184_v28 = vrot.slane %v177_v27, 4  ;;  %v179_v29 = vpop.f32.mrb[1].mxu0 }
 0x11c   :  { %v181_v30 = vpop.f32.mrb[2].mxu0 }
 0x11d   :  { %v185_v31 = vadd.f32 %v184_v28, %v177_v27  ;;  %v182_v32 = vpop.f32.mrb[3].mxu0  ;;  %v351_v28 = vrot.slane %v45_v51, %v350_v24 }
 0x11f   :  { %v186_v33 = vrot.slane %v185_v31, 2 }
 0x121   :  { %v187_v34 = vadd.f32 %v186_v33, %v185_v31 }
 0x123   :  { %v188_v35 = vrot.slane %v187_v34, 1 }
 0x125   :  { %v189_v36 = vadd.f32 %v188_v35, %v187_v34 }
 0x127   :  { %v190_v37 = vmul.f32 0.125, %v189_v36 }
 0x129   :  { %v191_v38 = vsub.f32 %v177_v27, %v190_v37 }
 0x12b   :  { %v192_v39 = vmul.f32 %v191_v38, %v191_v38 }
 0x12d   :  { %v193_v40 = vrot.slane %v192_v39, 4 }
 0x12f   :  { %v194_v41 = vadd.f32 %v193_v40, %v192_v39 }
 0x131   :  { %v195_v42 = vrot.slane %v194_v41, 2 }
 0x133   :  { %v196_v43 = vadd.f32 %v195_v42, %v194_v41 }
 0x135   :  { %v197_v44 = vrot.slane %v196_v43, 1 }
 0x137   :  { %v198_v45 = vadd.f32 %v197_v44, %v196_v43 }
 0x139   :  { %v199_v46 = vmul.f32 0.125, %v198_v45 }
 0x13b   :  { %v200_v48 = vadd.f32 1e-05, %v199_v46 }
 0x13d   :  { %468 = vrsqrt.f32 %v200_v48 }
 0x147   :  { %v469_v54 = vpop.eup %468 }
 0x148   :  { %v202_v55 = vmul.f32 %v469_v54, %v191_v38 }
 0x14a   :  { %v207_v57 = vmul.f32 %v206_v53, %v202_v55 }
 0x14c   :  { %v212_v58 = vadd.f32 %v211_v56, %v207_v57 }
 0x14e   :  { %v213_v59 = vsub.f32 0.0, %v212_v58 }
 0x150   :  { %v214_v60 = vmul.f32 1.442695, %v213_v59 }
 0x152   :  { %470 = vpow2.f32 %v214_v60 }
 0x15c   :  { %v471_v61 = vpop.eup %470 }
 0x15d   :  { %v216_v62 = vadd.f32 1.0, %v471_v61 }
 0x15f   :  { %472 = vrcp.f32 %v216_v62 }
 0x169   :  { %v473_v63 = vpop.eup %472 }
 0x16a   :  { %v218_v0 = vpack.c.bf16 %v473_v63, %v473_v63 }
 0x16c   :  { %425 = vmatmul.mubr.bf16.vlgmr.msra.gmra.mrb[0].mxu1 %v218_v0 }
 0x23f   :  { %v317_v1 = vpop.f32.mrb[0].mxu1 }
 0x240   :  { %v323_v2 = vadd.f32 %v317_v1, %v179_v29  ;;  %v426_v3 = vpop.f32.mrb[1].mxu1 }
 0x241   :  { %v320_v4 = vpop.f32.mrb[2].mxu1 }
 0x242   :  { %v324_v5 = vrot.slane %v323_v2, 4  ;;  %v427_v6 = vpop.f32.mrb[3].mxu1 }
 0x244   :  { %v325_v7 = vadd.f32 %v324_v5, %v323_v2 }
 0x246   :  { %v326_v8 = vrot.slane %v325_v7, 2 }
 0x248   :  { %v327_v9 = vadd.f32 %v326_v8, %v325_v7 }
 0x24a   :  { %v328_v10 = vrot.slane %v327_v9, 1 }
 0x24c   :  { %v329_v11 = vadd.f32 %v328_v10, %v327_v9 }
 0x24e   :  { %v330_v12 = vmul.f32 0.125, %v329_v11 }
 0x250   :  { %v331_v13 = vsub.f32 %v323_v2, %v330_v12 }
 0x252   :  { %v332_v14 = vmul.f32 %v331_v13, %v331_v13 }
 0x254   :  { %v333_v15 = vrot.slane %v332_v14, 4 }
 0x256   :  { %v334_v16 = vadd.f32 %v333_v15, %v332_v14 }
 0x258   :  { %v335_v17 = vrot.slane %v334_v16, 2 }
 0x25a   :  { %v336_v18 = vadd.f32 %v335_v17, %v334_v16 }
 0x25c   :  { %v337_v19 = vrot.slane %v336_v18, 1 }
 0x25e   :  { %v338_v20 = vadd.f32 %v337_v19, %v336_v18 }
 0x260   :  { %v339_v21 = vmul.f32 0.125, %v338_v20 }
 0x262   :  { %v340_v22 = vadd.f32 1e-05, %v339_v21 }
 0x264   :  { %474 = vrsqrt.f32 %v340_v22 }
 0x26e   :  { %v475_v26 = vpop.eup %474 }
 0x26f   :  { %v342_v27 = vmul.f32 %v475_v26, %v331_v13 }
 0x271   :  { %v347_v29 = vmul.f32 %v346_v25, %v342_v27 }
 0x273   :  { %v352_v30 = vadd.f32 %v351_v28, %v347_v29 }
 0x275   :  { %v353_v31 = vsub.f32 0.0, %v352_v30 }
 0x277   :  { %v354_v32 = vmul.f32 1.442695, %v353_v31 }
 0x279   :  { %476 = vpow2.f32 %v354_v32 }
 0x283   :  { %v477_v33 = vpop.eup %476 }
 0x284   :  { %v356_v34 = vadd.f32 1.0, %v477_v33 }
 0x286   :  { %478 = vrcp.f32 %v356_v34 }
 0x290   :  { %v479_v35 = vpop.eup %478 }
 0x291   :  { %358 = vst [vmem:[#allocation7] sm:$0xff] %v479_v35 }
 0x292   :  { %535 = shalt.err (!%p532_p6)
}
 0x293   :  { %s536_s8 = scalar_lea.hbm %s652_s4, 128 }
 0x294   :  { %p537_p7 = scmp.ne.s32.totalorder %s652_s4, %s536_s8  ;;  %p540_p8 = scmp.lt.u32.totalorder %s536_s8, %s652_s4 }
 0x296   :  { %p542_p9 = pnand %p540_p8, %p537_p7 }
 0x298   :  { %545 = shalt.err (!%p542_p9)
}
 0x299   :  { %368 = dma.vmem_to_hbm [thread:$0]  %s366_s30, 128, %s652_s4, [#allocation4]  }
 0x29a   :  { %550 = dma.done.wait [#allocation4], 128  }
 0x29b   :  { %551 = vsyncadd [#allocation4], 4294967168 }
 0x29c   :  { %372 = vsyncpa [#allocation3], 1 }
 0x29d   :  { %373 = vsyncpa [#allocation6], 1 }
 0x29e   :  { %374 = vsyncpa [#allocation4], 1 }

</bundles_post_ra>
